<compile_context>
chip_gen: v6e
topology: v6e:2x2x1
jax: 0.10.0
libtpu: 0.0.40
codegen_flags: <defaults>
</compile_context>

<pallas_src>
import math
from functools import partial

import numpy as np
import jax
import jax.numpy as jnp
from jax import lax
from jax.experimental import pallas as pl
from jax.experimental.pallas import tpu as pltpu


_MIN_VMEM = 32 * 1024 * 1024
_MAX_VMEM = 64 * 1024 * 1024


def _vmem_limit(est_bytes):
    """Explicit scoped-VMEM limit (v5e default is only 16 MiB; cap for v7x)."""
    return int(min(max(2 * est_bytes, _MIN_VMEM), _MAX_VMEM))


def _pick_head_group(H, D):
    """Smallest divisor G of H with G*D >= 128 (lane-dense context store)."""
    for G in range(1, H + 1):
        if H % G == 0 and G * D >= 128:
            return G
    return H


# ----------------------- kernel A: sparsity measure M -----------------------

def _m_kernel(q_ref, k_ref, cnt_ref, m_ref):
    # q_ref:(L_Q,E)  k_ref:(L_K,E)  cnt_ref:(L_K,L_Q)  m_ref:(1,L_Q)
    q = q_ref[...]
    k = k_ref[...]
    cnt = cnt_ref[...]
    L_K = k.shape[0]

    # Full K @ Q^T with L_Q on lanes so the sublane reductions below land
    # directly in the lane-dense M layout.  Kept f32 on purpose (top-k parity).
    kq = lax.dot_general(k, q, (((1,), (1,)), ((), ())),
                         preferred_element_type=jnp.float32)          # (L_K, L_Q)

    # NaN-safety: every query samples U_part >= 1 keys, so each column of cnt
    # has >= 1 nonzero entry and the masked max is never all -inf.
    neg = jnp.full_like(kq, -jnp.inf)
    mx = jnp.max(jnp.where(cnt > 0.0, kq, neg), axis=0, keepdims=True)  # (1,L_Q)
    sm = jnp.sum(cnt * kq, axis=0, keepdims=True)                       # (1,L_Q)
    m_ref[...] = mx - sm * (1.0 / float(L_K))


def _m_scores_call(Q, K, counts_T):
    B, H, L_Q, E = Q.shape
    L_K = K.shape[2]
    BH = B * H
    Qm = Q.reshape(BH, L_Q, E)          # free row-major reshape
    Km = K.reshape(BH, L_K, E)

    est = 2 * (L_Q * E + L_K * E + L_Q) * 4 + 4 * (L_K * L_Q) * 4
    m = pl.pallas_call(
        _m_kernel,
        out_shape=jax.ShapeDtypeStruct((BH, 1, L_Q), jnp.float32),
        grid=(BH,),
        in_specs=[
            pl.BlockSpec((None, L_Q, E), lambda g: (g, 0, 0)),
            pl.BlockSpec((None, L_K, E), lambda g: (g, 0, 0)),
            pl.BlockSpec((L_K, L_Q), lambda g: (0, 0)),   # shared, VMEM-resident
        ],
        out_specs=pl.BlockSpec((None, 1, L_Q), lambda g: (g, 0, 0)),
        compiler_params=pltpu.CompilerParams(
            dimension_semantics=("parallel",),
            vmem_limit_bytes=_vmem_limit(est)),
    )(Qm, Km, counts_T)
    return m.reshape(B, H, L_Q)


# ------------------- kernel B: fused attention + context --------------------

def _attn_kernel(qr_ref, k_ref, v_ref, idx_ref, sel_ref, tri_ref, ctx_ref, *,
                 scale, mask_flag, G):
    # qr_ref:(G,u,E) k_ref:(G,L_K,E) v_ref:(G,L_V,D) idx_ref:(G,u,1) int32
    # sel_ref:(G,L_Q,1) f32  tri_ref:(L_Q,L_Q) bf16  ctx_ref:(L_Q,G*D) f32
    L_Q = tri_ref.shape[0]
    L_K = k_ref.shape[1]
    D = v_ref.shape[2]

    parts = []
    for h in range(G):                       # short unrolled per-head loop
        q_red = qr_ref[h]                    # (u, E) f32, gathered in wrapper
        k = k_ref[h]                         # (L_K, E)
        v = v_ref[h]                         # (L_V, D)
        idx = idx_ref[h]                     # (u, 1) int32
        u = q_red.shape[0]

        # scores = Q_reduce @ K^T * scale  (bf16 MXU inputs, f32 accumulate)
        scores = lax.dot_general(q_red.astype(jnp.bfloat16),
                                 k.astype(jnp.bfloat16),
                                 (((1,), (1,)), ((), ())),
                                 preferred_element_type=jnp.float32) * scale

        if mask_flag:
            # ProbMask: mask key positions strictly after the selected query
            # position.  col == idx is always allowed -> no fully masked row
            # (softmax stays NaN-free).
            col = lax.broadcasted_iota(jnp.int32, (u, L_K), 1)
            scores = jnp.where(col > idx, -jnp.inf, scores)

        # softmax over keys; divide moved to the EUP via approx reciprocal
        mx = jnp.max(scores, axis=-1, keepdims=True)
        e = jnp.exp(scores - mx)
        attn = e * pl.reciprocal(jnp.sum(e, axis=-1, keepdims=True), approx=True)

        out = jnp.dot(attn.astype(jnp.bfloat16), v.astype(jnp.bfloat16),
                      preferred_element_type=jnp.float32)             # (u, D)

        if mask_flag:
            # cumsum(V, axis=-2) as hoisted lower-tri ones (bf16, 0/1 exact) @ V
            ctx0 = jnp.dot(tri_ref[...], v.astype(jnp.bfloat16),
                           preferred_element_type=jnp.float32)        # (L_Q, D)
        else:
            ctx0 = jnp.broadcast_to(jnp.mean(v, axis=0, keepdims=True), (L_Q, D))

        # fused scatter: context[idx[i], :] = out[i, :]
        # one-hot & out kept f32 (exact 1.0 placement; top-k indices unique);
        # the row-selection mask is precomputed in the wrapper (no width-1 MXU op).
        qpos = lax.broadcasted_iota(jnp.int32, (u, L_Q), 1)
        oh = (qpos == idx).astype(jnp.float32)                        # (u, L_Q)
        scattered = lax.dot_general(oh, out, (((0,), (0,)), ((), ())),
                                    preferred_element_type=jnp.float32)  # (L_Q,D)
        parts.append(jnp.where(sel_ref[h] > 0.5, scattered, ctx0))

    # single lane-dense (L_Q, G*D) store
    ctx_ref[...] = parts[0] if G == 1 else jnp.concatenate(parts, axis=-1)


def _attn_context_call(Q_red, K, V, index, sel_mask, tri, scale, mask_flag):
    B, H, u, E = Q_red.shape
    L_K = K.shape[2]
    L_V, D = V.shape[2], V.shape[3]
    L_Q = tri.shape[0]

    G = _pick_head_group(H, D)
    NG = H // G

    # merged (batch, head-group) layouts — free row-major reshapes
    Qr = Q_red.reshape(B * NG, G, u, E)
    Kg = K.reshape(B * NG, G, L_K, E)
    Vg = V.reshape(B * NG, G, L_V, D)
    idxg = index.reshape(B * NG, G, u, 1).astype(jnp.int32)
    selg = sel_mask.reshape(B * NG, G, L_Q, 1)

    est = (2 * (G * u * E + G * L_K * E + G * L_V * D + G * u + G * L_Q
                + L_Q * G * D) * 4
           + 2 * L_Q * L_Q * 2 + 4 * G * L_Q * D * 4)

    # NOTE(v7x): keep grid extent B*NG even so both TensorCores stay busy.
    ctx = pl.pallas_call(
        partial(_attn_kernel, scale=float(scale), mask_flag=mask_flag, G=G),
        out_shape=jax.ShapeDtypeStruct((B, L_Q, H * D), jnp.float32),
        grid=(B * NG,),
        in_specs=[
            pl.BlockSpec((None, G, u, E), lambda g: (g, 0, 0, 0)),
            pl.BlockSpec((None, G, L_K, E), lambda g: (g, 0, 0, 0)),
            pl.BlockSpec((None, G, L_V, D), lambda g: (g, 0, 0, 0)),
            pl.BlockSpec((None, G, u, 1), lambda g: (g, 0, 0, 0)),
            pl.BlockSpec((None, G, L_Q, 1), lambda g: (g, 0, 0, 0)),
            pl.BlockSpec((L_Q, L_Q), lambda g: (0, 0)),   # hoisted tri, resident
        ],
        out_specs=pl.BlockSpec((None, L_Q, G * D),
                               lambda g: (g // NG, 0, g % NG)),
        compiler_params=pltpu.CompilerParams(
            dimension_semantics=("parallel",),
            vmem_limit_bytes=_vmem_limit(est)),
    )(Qr, Kg, Vg, idxg, selg, tri)
    return ctx    # (B, L_Q, H*D) lane-dense layout


# ------------------------------- forward pass -------------------------------

def prob_attention_forward(queries, keys, values, attn_mask=None, *,
                           factor=5, scale=None, mask_flag=True,
                           output_attention=False, sample_key=None):
    """Pallas implementation of ProbAttention.forward (dropout is unused in the
    reference forward; output_attention=False path)."""
    del attn_mask  # mask_flag=True builds its own ProbMask, matching the reference
    if sample_key is None:
        sample_key = jax.random.PRNGKey(42)

    B, L_Q, H, D = queries.shape
    _, L_K, _, _ = keys.shape

    # Reproduce the module's raw `.view(B, H, L, -1)` (a reinterpretation, NOT a
    # head transpose) with a row-major reshape — intentional, do not "fix".
    Q = queries.reshape(B, H, L_Q, D)
    K = keys.reshape(B, H, L_K, D)
    V = values.reshape(B, H, L_K, D)

    U_part = factor * int(np.ceil(np.log(L_K)))     # sample_k
    u = min(factor * int(np.ceil(np.log(L_Q))), L_Q)  # n_top

    # Random key-sampling indices (== torch.randint(L_K, (L_Q, sample_k))).
    # Build a tiny (L_K, L_Q) multiplicity matrix shared by every head instead
    # of materializing K_sample (B,H,L_Q,U_part,D) in HBM.
    index_sample = jax.random.randint(sample_key, (L_Q, U_part), 0, L_K)
    counts = jnp.zeros((L_Q, L_K), jnp.float32).at[
        jnp.arange(L_Q)[:, None], index_sample].add(1.0)
    counts_T = counts.T                                             # (L_K, L_Q)

    # sparsity measure M (kernel A) + top-u selection (JAX glue)
    M = _m_scores_call(Q, K, counts_T)                              # (B, H, L_Q)
    _, M_top = lax.top_k(M, u)                                      # (B, H, u)

    sc = scale if scale is not None else 1.0 / math.sqrt(D)
    if mask_flag:
        assert L_Q == V.shape[2], "mask_flag=True requires L_Q == L_V"

    # Q_reduce gathered here (tiny XLA gather) so kernel B never DMAs full Q;
    # scatter row-mask precomputed here (removes the width-1 MXU `sel` matmul).
    Q_red = jnp.take_along_axis(Q, M_top[..., None], axis=2)        # (B, H, u, D)
    b_idx = jnp.arange(B)[:, None, None]
    h_idx = jnp.arange(H)[None, :, None]
    sel_mask = jnp.zeros((B, H, L_Q), jnp.float32).at[
        b_idx, h_idx, M_top].set(1.0)[..., None]                    # (B, H, L_Q, 1)

    # hoisted cumsum operator, bf16 (0/1 exact), kept VMEM-resident by kernel B
    tri = jnp.tril(jnp.ones((L_Q, L_Q), jnp.bfloat16))

    ctx_flat = _attn_context_call(Q_red, K, V, M_top, sel_mask, tri, sc, mask_flag)

    # (B, L_Q, H*D) is the lane-dense kernel layout (natural for the projection
    # that follows ProbAttention in Informer); transpose back to the module's
    # (B, H, L_Q, D) contract.
    context = ctx_flat.reshape(B, L_Q, H, D).transpose(0, 2, 1, 3)

    # TODO(synk): output_attention=True path (dense attention map) not implemented.
    return context, None


# --------------------------- pure-JAX reference -----------------------------

def _reference_forward(queries, keys, values, *, factor=5, scale=None, sample_key=None):
    if sample_key is None:
        sample_key = jax.random.PRNGKey(42)
    B, L_Q, H, D = queries.shape
    _, L_K, _, _ = keys.shape
    Q = queries.reshape(B, H, L_Q, D)
    K = keys.reshape(B, H, L_K, D)
    V = values.reshape(B, H, L_K, D)

    U_part = factor * int(np.ceil(np.log(L_K)))
    u = min(factor * int(np.ceil(np.log(L_Q))), L_Q)

    index_sample = jax.random.randint(sample_key, (L_Q, U_part), 0, L_K)
    K_sample = K[:, :, index_sample, :]
    QKs = jnp.einsum('bhqe,bhqse->bhqs', Q, K_sample)
    M = QKs.max(-1) - QKs.sum(-1) / L_K
    _, M_top = lax.top_k(M, u)

    Q_reduce = jnp.take_along_axis(Q, M_top[..., None], axis=2)
    sc = scale if scale is not None else 1.0 / math.sqrt(D)
    scores = jnp.einsum('bhue,bhke->bhuk', Q_reduce, K) * sc
    col = jnp.arange(L_K)[None, None, None, :]
    scores = jnp.where(col > M_top[..., None], -jnp.inf, scores)
    attn = jax.nn.softmax(scores, axis=-1)

    ctx = jnp.cumsum(V, axis=-2)
    out = jnp.einsum('bhuk,bhkd->bhud', attn, V)
    b_idx = jnp.arange(B)[:, None, None]
    h_idx = jnp.arange(H)[None, :, None]
    return ctx.at[b_idx, h_idx, M_top, :].set(out)


# ----------------------------------- main -----------------------------------

if __name__ == "__main__":
    B, L, H, D = 2, 16, 4, 32     # (batch, seq, heads, head_dim)
    key = jax.random.PRNGKey(0)
    kq, kk, kv = jax.random.split(key, 3)
    queries = jax.random.normal(kq, (B, L, H, D), dtype=jnp.float32)
    keys = jax.random.normal(kk, (B, L, H, D), dtype=jnp.float32)
    values = jax.random.normal(kv, (B, L, H, D), dtype=jnp.float32)

    context, attn = prob_attention_forward(queries, keys, values, None)
    context = jax.block_until_ready(context)
    assert context.shape == (B, H, L, D)
    assert attn is None

    ref = jax.block_until_ready(_reference_forward(queries, keys, values))
    # bf16 MXU inputs (f32 accumulation) + approx reciprocal in kernel B ->
    # slightly looser tolerance (do not tighten without switching those back).
    np.testing.assert_allclose(np.asarray(context), np.asarray(ref),
                               rtol=3e-2, atol=5e-2)

    print("KERNEL_OK")
</pallas_src>

<mosaic_0001>
module attributes {stable_mosaic.version = 11 : i64} {
  func.func @_m_kernel(%arg0: i32, %arg1: memref<1x16x32xf32, #tpu.memory_space<vmem>>, %arg2: memref<1x16x32xf32, #tpu.memory_space<vmem>>, %arg3: memref<16x16xf32, #tpu.memory_space<vmem>>, %arg4: memref<1x1x16xf32, #tpu.memory_space<vmem>>) attributes {dimension_semantics = [#tpu.dimension_semantics<parallel>], iteration_bounds = array<i64: 8>, scalar_prefetch = 0 : i64, scratch_operands = 0 : i64, tpu.core_type = #tpu.core_type<tc>, window_params = [{transform_indices = @transform_0, window_bounds = array<i64: 1, 16, 32>}, {transform_indices = @transform_1, window_bounds = array<i64: 1, 16, 32>}, {pipeline_mode = #tpu.pipeline_mode<synchronous>, transform_indices = @transform_2, window_bounds = array<i64: 16, 16>}, {transform_indices = @transform_3, window_bounds = array<i64: 1, 1, 16>}]} {
    %c0 = arith.constant 0 : index
    %c0_0 = arith.constant 0 : index
    %c0_1 = arith.constant 0 : index
    %0 = vector.load %arg1[%c0, %c0_0, %c0_1] : memref<1x16x32xf32, #tpu.memory_space<vmem>>, vector<1x16x32xf32>
    %1 = vector.shape_cast %0 : vector<1x16x32xf32> to vector<16x32xf32>
    %c0_2 = arith.constant 0 : index
    %c0_3 = arith.constant 0 : index
    %c0_4 = arith.constant 0 : index
    %2 = vector.load %arg2[%c0_2, %c0_3, %c0_4] : memref<1x16x32xf32, #tpu.memory_space<vmem>>, vector<1x16x32xf32>
    %3 = vector.shape_cast %2 : vector<1x16x32xf32> to vector<16x32xf32>
    %c0_5 = arith.constant 0 : index
    %c0_6 = arith.constant 0 : index
    %4 = vector.load %arg3[%c0_5, %c0_6] : memref<16x16xf32, #tpu.memory_space<vmem>>, vector<16x16xf32>
    %cst = arith.constant dense<0.000000e+00> : vector<16x16xf32>
    %5 = tpu.matmul %3, %1, %cst {dimension_numbers = #tpu.dot_dimension_numbers<[1], [1], [0], [0], [0, 0, 1, 0], [], []>} : vector<16x32xf32>, vector<16x32xf32>, vector<16x16xf32> -> vector<16x16xf32>
    %cst_7 = arith.constant 0xFF800000 : f32
    %6 = vector.broadcast %cst_7 : f32 to vector<16x16xf32>
    %cst_8 = arith.constant 0.000000e+00 : f32
    %7 = vector.broadcast %cst_8 : f32 to vector<16x16xf32>
    %8 = arith.cmpf ogt, %4, %7 : vector<16x16xf32>
    %9 = arith.select %8, %5, %6 : vector<16x16xi1>, vector<16x16xf32>
    %cst_9 = arith.constant dense<0xFF800000> : vector<16xf32>
    %10 = vector.multi_reduction <maximumf>, %9, %cst_9 [0] : vector<16x16xf32> to vector<16xf32>
    %11 = vector.shape_cast %10 : vector<16xf32> to vector<1x16xf32>
    %12 = arith.mulf %4, %5 : vector<16x16xf32>
    %cst_10 = arith.constant dense<0.000000e+00> : vector<16xf32>
    %13 = vector.multi_reduction <add>, %12, %cst_10 [0] : vector<16x16xf32> to vector<16xf32>
    %14 = vector.shape_cast %13 : vector<16xf32> to vector<1x16xf32>
    %cst_11 = arith.constant 6.250000e-02 : f32
    %15 = vector.broadcast %cst_11 : f32 to vector<1x16xf32>
    %16 = arith.mulf %14, %15 : vector<1x16xf32>
    %17 = arith.subf %11, %16 : vector<1x16xf32>
    %c0_12 = arith.constant 0 : index
    %c0_13 = arith.constant 0 : index
    %c0_14 = arith.constant 0 : index
    %18 = vector.load %arg4[%c0_12, %c0_13, %c0_14] : memref<1x1x16xf32, #tpu.memory_space<vmem>>, vector<1x1x16xf32>
    %19 = vector.shape_cast %18 : vector<1x1x16xf32> to vector<1x16xf32>
    %20 = vector.shape_cast %17 : vector<1x16xf32> to vector<1x1x16xf32>
    tpu.vector_store %arg4[%c0_12, %c0_13, %c0_14], %20 {strides = array<i32>} : memref<1x1x16xf32, #tpu.memory_space<vmem>>, vector<1x1x16xf32>,
    return
  }
  func.func @transform_0(%arg0: i32) -> (i32, i32, i32) {
    %c0_i32 = arith.constant 0 : i32
    %c0_i32_0 = arith.constant 0 : i32
    %c0_i32_1 = arith.constant 0 : i32
    return %arg0, %c0_i32, %c0_i32_0 : i32, i32, i32
  }
  func.func @transform_1(%arg0: i32) -> (i32, i32, i32) {
    %c0_i32 = arith.constant 0 : i32
    %c0_i32_0 = arith.constant 0 : i32
    %c0_i32_1 = arith.constant 0 : i32
    return %arg0, %c0_i32, %c0_i32_0 : i32, i32, i32
  }
  func.func @transform_2(%arg0: i32) -> (i32, i32) {
    %c0_i32 = arith.constant 0 : i32
    %c0_i32_0 = arith.constant 0 : i32
    %c0_i32_1 = arith.constant 0 : i32
    return %c0_i32, %c0_i32_0 : i32, i32
  }
  func.func @transform_3(%arg0: i32) -> (i32, i32, i32) {
    %c0_i32 = arith.constant 0 : i32
    %c0_i32_0 = arith.constant 0 : i32
    %c0_i32_1 = arith.constant 0 : i32
    return %arg0, %c0_i32, %c0_i32_0 : i32, i32, i32
  }
}

</mosaic_0001>

<bundles_post_ra>
// kernel: tpu_custom_call.1
= control target key start
LH: loop header
LB: loop body
LE: loop exit
PB: predicated region body
PF: predicated region fallthrough
CT: control target
= control target key end

     0   :  { %s972_s0 = inlined_call_operand.hbm [shape: f32[8,16,32], index: 0, kind: input, shape index: {}]   ;;  %s973_s1 = inlined_call_operand.hbm [shape: f32[8,16,32], index: 1, kind: input, shape index: {}]   ;;  %s974_s2 = inlined_call_operand.hbm [shape: f32[16,16], index: 2, kind: input, shape index: {}]   ;;  %s975_s3 = inlined_call_operand.hbm [shape: f32[8,1,16], index: 3, kind: output, shape index: {}]  }
   0x1   :  { %983 = sst [smem:[#allocation13_spill]] %s972_s0 }
   0x2   :  { %984 = sst [smem:[#allocation14_spill]] %s974_s2 }
   0x3   :  { %8 = vsyncpa [#allocation3], 0 }
   0x4   :  { %10 = vsyncpa [#allocation3 + $0x1], 0 }
   0x5   :  { %11 = vsyncpa [#allocation6], 0 }
   0x6   :  { %13 = vsyncpa [#allocation6 + $0x1], 0 }
   0x7   :  { %14 = vsyncpa [#allocation4], 0 }
   0x8   :  { %16 = vsyncpa [#allocation4 + $0x1], 0  ;;  %s756_s12 = smov 0   ;;  %s758_s13 = smov 0  }
   0x9   :  { %s760_s14 = smov 0   ;;  %s762_s15 = smov 0  }
   0xa LB: > { %s777_s16 = sadd.s32 4294967295, %s728_s15   ;;  %s476_s17 = sadd.s32 4294967294, %s728_s15   ;;  %s728_s15 = sphi %s762_s15, %s1004_s15   ;;  %s724_s14 = sphi %s760_s14, %s1003_s14   ;;  %s720_s13 = sphi %s758_s13, %s1002_s13   ;;  %s716_s12 = sphi %s756_s12, %s1001_s12  }
   0xb   : > { %p42_p0 = scmp.ne.s32.totalorder %s720_s13, %s716_s12  ;;  %p980_p1 = scmp.eq.s32.totalorder %s777_s16, 0 }
   0xc   : > { %p119_p3 = scmp.eq.s32.totalorder %s476_s17, 7  ;;  %p477_p5 = scmp.ge.s32.totalorder %s728_s15, 1 }
   0xd   : > { %p786_p4 = por %p980_p1, %p42_p0  ;;  %p126_p7 = scmp.lt.s32.totalorder %s728_s15, 9 }
   0xe   : > { %p791_p6 = por %p119_p3, %p42_p0  ;;  %s730_s21 = smov [#allocation7]  }
   0xf   : > { %s985_s18 = scalar_select %p786_p4, 1, 0 }
  0x10   : > { %s986_s19 = scalar_select %p791_p6, 1, 0 }
  0x11   : > { %p796_p8 = pnand %p477_p5, %p126_p7  ;;  %s138_s22 = sshll.u32 %s730_s21, 4  ;;  %s139_s22 = int_to_ptr.vmem [resolvable:$true] %s138_s22 }
  0x12   : > { %s809_s24 = sadd.s32 1, %s728_s15   ;;  %s29_s25 = sadd.s32 1, %s724_s14 }
  0x13   : > { %p520_p9 = pneg %p796_p8  ;;  %s26_s26 = ssub.s32 %s728_s15, %s809_s24 }
  0x14   : > { %s585_s27 = scalar_lea.vmem %s139_s22, 256  ;;  %p593_p3 = scmp.lt.s32.totalorder %s139_s22, %s139_s22 }
  0x15   : > { %p804_p10 = pnand %p520_p9, %p980_p1  ;;  %p586_p12 = scmp.ne.s32.totalorder %s139_s22, %s585_s27 }
  0x16   : > { %p594_p5 = scmp.lt.s32.totalorder %s585_s27, %s585_s27 }
  0x17   : > { %p576_p11 = pneg %p804_p10 }
  0x18   : > { %p595_p7 = por %p594_p5, %p593_p3 }
  0x19   : > { %p588_p13 = pnand %p586_p12, %p576_p11 }
  0x1b   : > { %p589_p0 = pneg %p588_p13 }
  0x1d   : > { %p596_p2 = pnand %p595_p7, %p589_p0 }
  0x1f   : > { %599 = shalt.err (!%p596_p2)
}
  0x20   : > { %s976_s28 = smov 128   ;;  %s978_s29 = smov 8  }
  0x21   : > { %s989_s2 = sld [smem:[#allocation14_spill]]  ;;  %p27_p2 = scmp.eq.s32.totalorder %s26_s26, 0 }
  0x22   : > { %p36_p9 = scmp.ne.s32.totalorder %s724_s14, %s720_s13  ;;  %p37_p11 = scmp.eq.s32.totalorder %s728_s15, 0 }
  0x23   : > { %p536_p12 = scmp.lt.s32.totalorder %s728_s15, 8  ;;  %p990_p0 = scmp.eq.s32.totalorder %s777_s16, 7 }
  0x24   : > { %s829_s5 = scalar_select %p27_p2, %s724_s14, %s29_s25  }
  0x25   : > { %p38_p13 = por %p37_p11, %p36_p9  ;;  %p833_p3 = por %p990_p0, %p36_p9 }
  0x26   : > { %s152_s7 = sand.u32 1, %s724_s14   ;;  %s497_s8 = sshll.u32 %s728_s15, 8 }
  0x27   : > { %523 = dma.hbm_to_vmem [thread:$0]  (!%p804_p10), %s989_s2, 256, %s139_s22, [#allocation6], %s976_s28, %s976_s28, %s978_s29  }
  0x28   : > { %s991_s6 = scalar_select %p833_p3, 1, 0 }
  0x29   : > { %s839_s9 = sshll.u32 %s152_s7, 4  ;;  %s992_s0 = sld [smem:[#allocation13_spill]] }
  0x2a   : > { %s156_s21 = scalar_lea.vmem [#allocation2], %s839_s9  ;;  %p847_p10 = pnand %p536_p12, %p38_p13 }
  0x2b   : > { %s163_s22 = sshll.u32 %s156_s21, 4  ;;  %s856_s27 = scalar_lea.hbm %s973_s1, %s497_s8  ;;  %s851_s22 = int_to_ptr.vmem [resolvable:$true] %s163_s22 }
  0x2c   : > { %s858_s30 = scalar_lea.sflag [#allocation3], %s152_s7  ;;  %p602_p7 = pneg %p847_p10 }
  0x2f   : > { %s844_s17 = scalar_lea.hbm %s992_s0, %s497_s8  ;;  %s605_s21 = scalar_lea.hbm %s992_s0, 2048 }
  0x30   : > { %s600_s4 = scalar_lea.hbm %s844_s17, 256  ;;  %p606_p11 = scmp.lt.s32.totalorder %s844_s17, %s992_s0 }
  0x31   : > { %p601_p5 = scmp.ne.s32.totalorder %s844_s17, %s600_s4  ;;  %p607_p12 = scmp.lt.s32.totalorder %s605_s21, %s600_s4 }
  0x33   : > { %p603_p2 = pnand %p602_p7, %p601_p5  ;;  %p608_p13 = por %p607_p12, %p606_p11 }
  0x35   : > { %p604_p9 = pneg %p603_p2 }
  0x37   : > { %p609_p0 = pnand %p608_p13, %p604_p9 }
  0x39   : > { %612 = shalt.err (!%p609_p0)
}
  0x3a   : > { %s613_s7 = scalar_lea.vmem %s851_s22, 256  ;;  %s733_s8 = smov [#allocation2]  }
  0x3b   : > { %p614_p1 = scmp.ne.s32.totalorder %s851_s22, %s613_s7  ;;  %s618_s25 = sshll.u32 %s733_s8, 4  ;;  %s619_s25 = int_to_ptr.vmem [resolvable:$false] %s618_s25 }
  0x3c   : > { %s620_s26 = scalar_lea.vmem %s619_s25, 512  ;;  %p621_p6 = scmp.lt.s32.totalorder %s851_s22, %s619_s25 }
  0x3d   : > { %p616_p5 = pnand %p614_p1, %p602_p7  ;;  %p622_p3 = scmp.lt.s32.totalorder %s620_s26, %s613_s7 }
  0x3f   : > { %p617_p2 = pneg %p616_p5  ;;  %p623_p4 = por %p622_p3, %p621_p6 }
  0x41   : > { %p624_p11 = pnand %p623_p4, %p617_p2 }
  0x43   : > { %627 = shalt.err (!%p624_p11)
}
  0x44   : > { %s994_s28 = smov 8   ;;  %s995_s29 = smov 128  }
  0x45   : > { %527 = dma.hbm_to_vmem [thread:$0]  (!%p847_p10), %s844_s17, 256, %s851_s22, %s858_s30, %s995_s29, %s995_s29, %s994_s28  }
  0x46   : > { %s177_s4 = scalar_lea.vmem [#allocation5], %s839_s9  ;;  %s173_s11 = sand.u32 1, %s728_s15  }
  0x47   : > { %s184_s10 = sshll.u32 %s177_s4, 4  ;;  %s174_s21 = scalar_lea.sflag [#allocation6], %s173_s11  ;;  %s890_s10 = int_to_ptr.vmem [resolvable:$true] %s184_s10 }
  0x48   : > { %s628_s7 = scalar_lea.hbm %s856_s27, 256  ;;  %s633_s26 = scalar_lea.hbm %s973_s1, 2048 }
  0x49   : > { %p629_p1 = scmp.ne.s32.totalorder %s856_s27, %s628_s7  ;;  %p634_p3 = scmp.lt.s32.totalorder %s856_s27, %s973_s1 }
  0x4a   : > { %p635_p9 = scmp.lt.s32.totalorder %s633_s26, %s628_s7 }
  0x4b   : > { %p631_p4 = pnand %p629_p1, %p602_p7 }
  0x4c   : > { %p636_p12 = por %p635_p9, %p634_p3 }
  0x4d   : > { %p632_p6 = pneg %p631_p4 }
  0x4f   : > { %p637_p13 = pnand %p636_p12, %p632_p6 }
  0x51   : > { %640 = shalt.err (!%p637_p13)
}
  0x52   : > { %s641_s9 = scalar_lea.vmem %s890_s10, 256  ;;  %s734_s17 = smov [#allocation5]  }
  0x53   : > { %p642_p0 = scmp.ne.s32.totalorder %s890_s10, %s641_s9  ;;  %s646_s22 = sshll.u32 %s734_s17, 4  ;;  %s647_s22 = int_to_ptr.vmem [resolvable:$false] %s646_s22 }
  0x54   : > { %s648_s30 = scalar_lea.vmem %s647_s22, 512  ;;  %p649_p11 = scmp.lt.s32.totalorder %s890_s10, %s647_s22 }
  0x55   : > { %p644_p5 = pnand %p642_p0, %p602_p7  ;;  %p650_p1 = scmp.lt.s32.totalorder %s648_s30, %s641_s9 }
  0x57   : > { %p645_p2 = pneg %p644_p5  ;;  %p651_p4 = por %p650_p1, %p649_p11 }
  0x59   : > { %p652_p3 = pnand %p651_p4, %p645_p2 }
  0x5b   : > { %655 = shalt.err (!%p652_p3)
}
  0x5c   : > { %530 = dma.hbm_to_vmem [thread:$0]  (!%p847_p10), %s856_s27, 256, %s890_s10, %s174_s21, %s995_s29, %s995_s29, %s994_s28  }
  0x5d   : > { %196 = sbr.rel (%p796_p8) target bundleno = 343 (0x157), region = 32  ;;  %s920_s0 = sand.u32 (!%p796_p8), 1, %s720_s13  }
  0x5e   : > { %s487_s2 = sshll.u32 (!%p796_p8), %s920_s0, 4  ;;  %s199_s4 = scalar_lea.sflag (!%p796_p8), [#allocation3], %s920_s0 }
  0x5f   : > { %s202_s11 = scalar_lea.vmem (!%p796_p8), [#allocation2], %s487_s2  ;;  %p996_p7 = scmp.ne.s32.totalorder (!%p796_p8), %s985_s18, 0 }
  0x62   : > { %699 = dma.done.wait (%p996_p7), %s199_s4, 256  }
  0x63   : > { %701 = vsyncadd (%p996_p7), %s199_s4, 4294967040  ;;  %s207_s23 = sand.u32 1, %s777_s16   ;;  %s211_s20 = scalar_lea.vmem [#allocation5], %s487_s2 }
  0x64   : > { %s208_s27 = scalar_lea.sflag [#allocation6], %s207_s23 }
  0x65   : > { %703 = dma.done.wait (%p996_p7), %s208_s27, 256  }
  0x66   : > { %705 = vsyncadd (%p996_p7), %s208_s27, 4294967040  ;;  %p997_p8 = scmp.eq.s32.totalorder %s777_s16, 0 }
  0x68   : > { %707 = dma.done.wait (%p997_p8), [#allocation6], 256   ;;  %p998_p10 = pmov %p997_p8 }
  0x69   : > { %vm248_vm0 = vcmask 261120   ;;  %v243_v0 = vld [vmem:[%s202_s11 + $0x8] sm:$0xff]  ;;  %v242_v1 = vld [vmem:[%s202_s11] sm:$0xff]  ;;  %vm340_vm3 = vcmask 130048   ;;  %s494_s18 = sshll.u32 %s777_s16, 4  ;;  %s241_s28 = scalar_lea.vmem [#allocation8], %s920_s0 }
  0x6a   : > { %709 = vsyncadd (%p998_p10), [#allocation6], 4294967040  ;;  %v244_v2 = vld [vmem:[%s211_s20] sm:$0xff]  ;;  %503 = vmatprep.subr.msk.mxu0 %vm248_vm0, %v243_v0  ;;  %v245_v3 = vld [vmem:[%s211_s20 + $0x8] sm:$0xff]  ;;  %s378_s29 = sshll.u32 %s241_s28, 4  ;;  %vm363_vm4 = vcmask 122880   ;;  %s376_s7 = scalar_lea.hbm %s975_s3, %s494_s18  ;;  %s379_s29 = int_to_ptr.vmem [resolvable:$true] %s378_s29 }
  0x6b   : > { %507 = vmatprep.mubr.msk.f32.mxu0 %vm248_vm0, %v244_v2  ;;  %504 = vmatpush3.xpose.msk.msra.mxu0 %vm248_vm0, %v243_v0  ;;  %v247_v4 = vld [vmem:[#allocation7 + $0x8] sm:$0xff]  ;;  %v246_v5 = vld [vmem:[#allocation7] sm:$0xff]  ;;  %s366_s8 = scalar_lea.sflag [#allocation4], %s920_s0  ;;  %s656_s25 = scalar_lea.vmem %s379_s29, 16 }
  0x6c   : > { %505 = vmatprep.subr.msk.mxu0 %vm248_vm0, %v242_v1  ;;  %vm337_vm1 = vcmp.gt.f32.partialorder %v247_v4, 0.0  ;;  %vm336_vm2 = vcmp.gt.f32.partialorder %v246_v5, 0.0  ;;  %p657_p6 = scmp.ne.s32.totalorder %s379_s29, %s656_s25  ;;  %p999_p9 = scmp.ne.s32.totalorder %s991_s6, 0 }
  0x6d   : > { %s735_s26 = smov [#allocation8]  }
  0x6e   : > { %p658_p12 = pnand %p657_p6, %p999_p9  ;;  %s660_s16 = sshll.u32 %s735_s26, 4  ;;  %s661_s16 = int_to_ptr.vmem [resolvable:$false] %s660_s16 }
  0x6f   : > { %506 = vmatpush3.xpose.msk.msra.mxu0 %vm248_vm0, %v242_v1  ;;  %s662_s9 = scalar_lea.vmem %s661_s16, 32  ;;  %p663_p0 = scmp.lt.s32.totalorder %s379_s29, %s661_s16 }
  0x70   : > { %p659_p13 = pneg %p658_p12  ;;  %p664_p5 = scmp.lt.s32.totalorder %s662_s9, %s656_s25 }
  0x72   : > { %508 = vmatmul.mubr.msk.f32.vlgmr.msra.gmra.mxu0 %vm248_vm0, %v245_v3  ;;  %p665_p2 = por %p664_p5, %p663_p0 }
  0x74   : > { %p666_p11 = pnand %p665_p2, %p659_p13 }
 0x132   : > { %v509_v6 = vpop.f32.mrf.mxu0 }
 0x133   : > { %v339_v7 = vsel %vm337_vm1, %v509_v6, -inf  ;;  %v351_v8 = vmul.f32 %v509_v6, %v247_v4 }
 0x134   : > { %v327_v9 = vpop.f32.mrf.mxu0  ;;  %v342_v12 = vsel %vm340_vm3, %v339_v7, -inf }
 0x135   : > { %v338_v10 = vsel %vm336_vm2, %v327_v9, -inf  ;;  %v350_v11 = vmul.f32 %v327_v9, %v246_v5  ;;  %v353_v14 = vsel %vm340_vm3, %v351_v8, 0.0 }
 0x136   : > { %v341_v13 = vsel %vm340_vm3, %v338_v10, -inf }
 0x137   : > { %v343_v15 = vmax.f32 %v341_v13, %v342_v12  ;;  %v352_v16 = vsel %vm340_vm3, %v350_v11, 0.0 }
 0x138   : > { %v354_v17 = vadd.f32 %v353_v14, %v352_v16 }
 0x139   : > { %v344_v18 = vrot.slane %v343_v15, 4 }
 0x13a   : > { %v355_v19 = vrot.slane %v354_v17, 4 }
 0x13b   : > { %v345_v20 = vmax.f32 %v343_v15, %v344_v18 }
 0x13c   : > { %v356_v21 = vadd.f32 %v355_v19, %v354_v17 }
 0x13d   : > { %v346_v22 = vrot.slane %v345_v20, 2 }
 0x13e   : > { %v357_v23 = vrot.slane %v356_v21, 2 }
 0x13f   : > { %v347_v24 = vmax.f32 %v345_v20, %v346_v22 }
 0x140   : > { %v358_v25 = vadd.f32 %v357_v23, %v356_v21 }
 0x141   : > { %v348_v26 = vrot.slane %v347_v24, 1 }
 0x142   : > { %v359_v27 = vrot.slane %v358_v25, 1 }
 0x143   : > { %v349_v29 = vmax.f32 %v347_v24, %v348_v26 }
 0x144   : > { %v360_v28 = vadd.f32 %v359_v27, %v358_v25 }
 0x146   : > { %v361_v30 = vmul.f32 0.0625, %v360_v28 }
 0x148   : > { %v362_v31 = vsub.f32 %v349_v29, %v361_v30 }
 0x14a   : > { %364 = vst.msk [vmem:[%s241_s28] sm:$0x1] %vm363_vm4, %v362_v31 }
 0x14b   : > { %669 = shalt.err (!%p666_p11)
}
 0x14c   : > { %s670_s17 = scalar_lea.hbm %s376_s7, 16  ;;  %s674_s0 = scalar_lea.hbm %s975_s3, 128 }
 0x14d   : > { %p671_p1 = scmp.ne.s32.totalorder %s376_s7, %s670_s17  ;;  %p675_p7 = scmp.lt.s32.totalorder %s376_s7, %s975_s3 }
 0x14e   : > { %p676_p8 = scmp.lt.s32.totalorder %s674_s0, %s670_s17 }
 0x14f   : > { %p672_p4 = pnand %p671_p1, %p999_p9 }
 0x150   : > { %p677_p10 = por %p676_p8, %p675_p7 }
 0x151   : > { %p673_p3 = pneg %p672_p4 }
 0x153   : > { %p678_p6 = pnand %p677_p10, %p673_p3 }
 0x155   : > { %681 = shalt.err (!%p678_p6)
}
 0x156   : > { %518 = dma.vmem_to_hbm [thread:$0]  (%p999_p9), %s379_s29, 16, %s376_s7, %s366_s8  }
 0x157 PF: > { %p538_p12 = scmp.ge.s32.totalorder %s728_s15, 2  ;;  %s390_s11 = sand.u32 1, %s716_s12  }
 0x158   : > { %p1000_p13 = scmp.ne.s32.totalorder %s986_s19, 0  ;;  %s391_s23 = scalar_lea.sflag [#allocation4], %s390_s11 }
 0x15a   : > { %p532_p0 = pnand %p538_p12, %p1000_p13 }
 0x15c   : > { %p533_p5 = pneg %p532_p0 }
 0x15e   : > { %711 = dma.done.wait (%p533_p5), %s391_s23, 16  }
 0x15f   : > { %713 = vsyncadd (%p533_p5), %s391_s23, 4294967280  ;;  %p19_p2 = scmp.ge.s32.totalorder %s809_s24, 10   ;;  %s1001_s12 = smov %s720_s13 }
 0x160   : > { %s1002_s13 = smov %s724_s14  ;;  %s1003_s14 = smov %s829_s5 }
 0x161   : > { %s1004_s15 = smov %s809_s24  ;;  %21 = sbr.rel (!%p19_p2) target bundleno = 10 (0xa), region = 94 }
 0x166   :  { %395 = vsyncpa [#allocation3], 1 }
 0x167   :  { %397 = vsyncpa [#allocation3 + $0x1], 1 }
 0x168   :  { %398 = vsyncpa [#allocation6], 1 }
 0x169   :  { %400 = vsyncpa [#allocation6 + $0x1], 1 }
 0x16a   :  { %401 = vsyncpa [#allocation4], 1 }
 0x16b   :  { %403 = vsyncpa [#allocation4 + $0x1], 1 }

</bundles_post_ra>
